<compile_context>
chip_gen: v7x
topology: tpu7x:2x2x1
jax: 0.10.0
libtpu: 0.0.40
codegen_flags: <defaults>
</compile_context>

<pallas_src>
import jax
import jax.numpy as jnp
from jax import lax
from jax.experimental import pallas as pl
from jax.experimental.pallas import tpu as pltpu


def attention_kernel(lens_ref, x_ref, w_in_ref, b_in_ref, w_att_ref,
                     out_ref, alpha_ref):
    TB, T, D = x_ref.shape
    A = w_in_ref.shape[1]

    x_bf = x_ref[...]                                # (TB, T, D) bf16 (DMA'd as bf16)
    x2_bf = x_bf.reshape(TB * T, D)

    # linear_in: one big bf16 MXU matmul, f32 accumulate, + bias + tanh (EUP, f32)
    h = jnp.tanh(
        jnp.dot(x2_bf, w_in_ref[...], preferred_element_type=jnp.float32)
        + b_in_ref[...]                              # (1, A) f32 broadcast
    )                                                # (TB*T, A) f32

    # linear_att (A -> 1, no bias): VPU multiply + lane reduce (no skinny MXU tile)
    h3 = h.reshape(TB, T, A)
    score = jnp.sum(h3 * w_att_ref[...], axis=-1)    # (TB, T) f32

    # length_to_negative_mask: vectorized compare against the (TB,1) lengths block
    t_idx = lax.broadcasted_iota(jnp.int32, (TB, T), 1)
    neg_mask = jnp.where(t_idx < lens_ref[...], 0.0, -1e9).astype(jnp.float32)

    # masked softmax over the sequence axis (f32 throughout; v5e-safe)
    logits = score + neg_mask
    m = jnp.max(logits, axis=-1, keepdims=True)
    e = jnp.exp(logits - m)
    denom = jnp.sum(e, axis=-1, keepdims=True)
    alpha = e * pl.reciprocal(denom, approx=True)    # (TB, T) f32
    alpha_ref[...] = alpha

    # weighted pooling over T on the VPU/XLU in f32 (no M=1 MXU matmuls)
    x_f32 = x_bf.astype(jnp.float32)
    out_ref[...] = jnp.sum(x_f32 * alpha[:, :, None], axis=1)   # (TB, D) f32


def _vmem_budget_bytes():
    """Generation-aware VMEM budget: ~48 MiB on v7x (64 MiB physical),
    ~96 MiB on v5e/v6e (128 MiB physical)."""
    cap = 64 * 1024 * 1024                           # conservative (v7x-safe) default
    try:
        info = pltpu.get_tpu_info()
        cap = int(getattr(info, "vmem_capacity_bytes", cap))
    except Exception:
        pass
    return min((cap * 3) // 4, 112 * 1024 * 1024)    # leave headroom for scratch/spills


def attention_forward(x, w_in, b_in, w_att, seq_lengths, *, max_batch_tile=1024):
    """x: (B, T, D) f32; w_in: (D, A); b_in: (A,); w_att: (A, 1);
    seq_lengths: (B,) int. Returns (out (B, D), alpha (B, T))."""
    B, T, D = x.shape
    A = w_in.shape[1]

    vmem_budget = _vmem_budget_bytes()

    # ---- batch-tile selection: largest multiple of 8 fitting the budget ----
    def tile_bytes(tb):
        x_tile = tb * T * D * 2                      # bf16 x tile
        lens_tile = tb * 4                           # int32 lengths tile
        out_tiles = tb * D * 4 + tb * T * 4          # f32 out + alpha tiles
        interm = tb * T * (A * 4 + D * 4 + 3 * 4)    # h, f32 x copy, logits/e/alpha
        weights = D * A * 2 + 2 * A * 4              # resident bf16 W + f32 b/w_att
        # inputs & outputs are double-buffered by the BlockSpec pipeline
        return 2 * (x_tile + lens_tile + out_tiles) + interm + weights

    if B <= 8:
        TB = B                                       # block == full batch dim
    else:
        TB = max(8, (min(max_batch_tile, ((B + 7) // 8) * 8) // 8) * 8)
        while TB > 8 and int(tile_bytes(TB) * 1.2) > vmem_budget:
            TB -= 8
        # v7x has 2 TensorCores: keep >= 2 grid steps so the "parallel" batch
        # axis can be sharded across both cores.
        TB = min(TB, max(8, ((B // 2 + 7) // 8) * 8))

    Bp = ((B + TB - 1) // TB) * TB
    if Bp != B:                                      # pad batch to a TB multiple
        x = jnp.pad(x, ((0, Bp - B), (0, 0), (0, 0)))
        seq_lengths = jnp.pad(seq_lengths, (0, Bp - B))

    # Input prep: bf16 x (halves HBM DMA bytes), bf16 resident weight, f32 bias/att.
    x_bf = x.astype(jnp.bfloat16)                    # (Bp, T, D)
    lengths = seq_lengths.astype(jnp.int32).reshape(Bp, 1)
    w_in_bf = w_in.astype(jnp.bfloat16)              # (D, A)
    b_in2 = b_in.reshape(1, A).astype(jnp.float32)
    w_att_row = w_att.reshape(1, A).astype(jnp.float32)

    grid = (Bp // TB,)
    out, alpha = pl.pallas_call(
        attention_kernel,
        out_shape=(jax.ShapeDtypeStruct((Bp, D), jnp.float32),
                   jax.ShapeDtypeStruct((Bp, T), jnp.float32)),
        grid=grid,
        in_specs=[
            pl.BlockSpec((TB, 1),    lambda i: (i, 0)),     # lengths (int32, VMEM)
            pl.BlockSpec((TB, T, D), lambda i: (i, 0, 0)),  # x (bf16)
            pl.BlockSpec((D, A),     lambda i: (0, 0)),     # w_in (bf16, resident)
            pl.BlockSpec((1, A),     lambda i: (0, 0)),     # b_in (f32)
            pl.BlockSpec((1, A),     lambda i: (0, 0)),     # w_att (f32)
        ],
        out_specs=(
            pl.BlockSpec((TB, D), lambda i: (i, 0)),
            pl.BlockSpec((TB, T), lambda i: (i, 0)),
        ),
        compiler_params=pltpu.CompilerParams(
            dimension_semantics=("parallel",),
            vmem_limit_bytes=vmem_budget),
    )(lengths, x_bf, w_in_bf, b_in2, w_att_row)
    return out[:B], alpha[:B]


def reference_forward(x, w_in, b_in, w_att, seq_lengths):
    """Pure-JAX f32 reference mirroring the PyTorch forward."""
    att_vector = jnp.einsum('btd,da->bta', x, w_in) + b_in
    att_hid = jnp.tanh(att_vector)
    att_score = jnp.einsum('bta,ao->bto', att_hid, w_att)[..., 0]   # (B, T)
    T = x.shape[1]
    t_idx = jnp.arange(T)[None, :]
    mask = jnp.where(t_idx < seq_lengths[:, None], 0.0, -1e9)
    alpha = jax.nn.softmax(att_score + mask, axis=1)
    return jnp.sum(x * alpha[:, :, None], axis=1), alpha


if __name__ == "__main__":
    # Small shapes consistent with the module: batch=2, seq=8, in_size=32, att_size=16
    B, T, D, A = 2, 8, 32, 16
    key = jax.random.PRNGKey(0)
    k_x, k_w1, k_b1, k_w2 = jax.random.split(key, 4)

    x = jax.random.normal(k_x, (B, T, D), dtype=jnp.float32)
    w_in = jax.random.normal(k_w1, (D, A), dtype=jnp.float32) * (1.0 / jnp.sqrt(D))
    b_in = jax.random.normal(k_b1, (A,), dtype=jnp.float32) * 0.1
    w_att = jax.random.normal(k_w2, (A, 1), dtype=jnp.float32) * (1.0 / jnp.sqrt(A))
    seq_lengths = jnp.array([8, 5], dtype=jnp.int32)

    out, alpha = attention_forward(x, w_in, b_in, w_att, seq_lengths)
    jax.block_until_ready((out, alpha))

    ref_out, ref_alpha = reference_forward(x, w_in, b_in, w_att, seq_lengths)
    # bf16 x / MXU operands + approx reciprocal -> looser tolerance vs f32 reference
    assert jnp.allclose(out, ref_out, atol=5e-2, rtol=5e-2)
    assert jnp.allclose(alpha, ref_alpha, atol=5e-2, rtol=5e-2)

    print("KERNEL_OK")
</pallas_src>

<mosaic_0001>
module attributes {stable_mosaic.version = 11 : i64} {
  func.func @attention_kernel(%arg0: i32, %arg1: memref<2x1xi32, #tpu.memory_space<vmem>>, %arg2: memref<2x8x32xbf16, #tpu.memory_space<vmem>>, %arg3: memref<32x16xbf16, #tpu.memory_space<vmem>>, %arg4: memref<1x16xf32, #tpu.memory_space<vmem>>, %arg5: memref<1x16xf32, #tpu.memory_space<vmem>>, %arg6: memref<2x32xf32, #tpu.memory_space<vmem>>, %arg7: memref<2x8xf32, #tpu.memory_space<vmem>>) attributes {dimension_semantics = [#tpu.dimension_semantics<parallel>], iteration_bounds = array<i64: 1>, scalar_prefetch = 0 : i64, scratch_operands = 0 : i64, tpu.core_type = #tpu.core_type<tc>, window_params = [{transform_indices = @transform_0, window_bounds = array<i64: 2, 1>}, {transform_indices = @transform_1, window_bounds = array<i64: 2, 8, 32>}, {pipeline_mode = #tpu.pipeline_mode<synchronous>, transform_indices = @transform_2, window_bounds = array<i64: 32, 16>}, {pipeline_mode = #tpu.pipeline_mode<synchronous>, transform_indices = @transform_3, window_bounds = array<i64: 1, 16>}, {pipeline_mode = #tpu.pipeline_mode<synchronous>, transform_indices = @transform_4, window_bounds = array<i64: 1, 16>}, {transform_indices = @transform_5, window_bounds = array<i64: 2, 32>}, {transform_indices = @transform_6, window_bounds = array<i64: 2, 8>}]} {
    %c0 = arith.constant 0 : index
    %c0_0 = arith.constant 0 : index
    %c0_1 = arith.constant 0 : index
    %0 = vector.load %arg2[%c0, %c0_0, %c0_1] : memref<2x8x32xbf16, #tpu.memory_space<vmem>>, vector<2x8x32xbf16>
    %1 = vector.shape_cast %0 : vector<2x8x32xbf16> to vector<16x32xbf16>
    %c0_2 = arith.constant 0 : index
    %c0_3 = arith.constant 0 : index
    %2 = vector.load %arg3[%c0_2, %c0_3] : memref<32x16xbf16, #tpu.memory_space<vmem>>, vector<32x16xbf16>
    %cst = arith.constant dense<0.000000e+00> : vector<16x16xf32>
    %3 = tpu.matmul %1, %2, %cst {dimension_numbers = #tpu.dot_dimension_numbers<[1], [0], [0], [1], [0, 0, 1, 1], [], []>} : vector<16x32xbf16>, vector<32x16xbf16>, vector<16x16xf32> -> vector<16x16xf32>
    %c0_4 = arith.constant 0 : index
    %c0_5 = arith.constant 0 : index
    %4 = vector.load %arg4[%c0_4, %c0_5] : memref<1x16xf32, #tpu.memory_space<vmem>>, vector<1x16xf32>
    %5 = vector.broadcast %4 : vector<1x16xf32> to vector<16x16xf32>
    %6 = arith.addf %3, %5 : vector<16x16xf32>
    %7 = math.tanh %6 : vector<16x16xf32>
    %8 = vector.shape_cast %7 : vector<16x16xf32> to vector<2x8x16xf32>
    %c0_6 = arith.constant 0 : index
    %c0_7 = arith.constant 0 : index
    %9 = vector.load %arg5[%c0_6, %c0_7] : memref<1x16xf32, #tpu.memory_space<vmem>>, vector<1x16xf32>
    %10 = vector.shape_cast %9 : vector<1x16xf32> to vector<1x1x16xf32>
    %11 = vector.broadcast %10 : vector<1x1x16xf32> to vector<2x8x16xf32>
    %12 = arith.mulf %8, %11 : vector<2x8x16xf32>
    %cst_8 = arith.constant dense<0.000000e+00> : vector<2x8xf32>
    %13 = vector.multi_reduction <add>, %12, %cst_8 [2] : vector<2x8x16xf32> to vector<2x8xf32>
    %14 = tpu.iota {dimensions = array<i32: 1>} : vector<2x8xi32>
    %c0_9 = arith.constant 0 : index
    %c0_10 = arith.constant 0 : index
    %15 = vector.load %arg1[%c0_9, %c0_10] : memref<2x1xi32, #tpu.memory_space<vmem>>, vector<2x1xi32>
    %16 = vector.broadcast %15 : vector<2x1xi32> to vector<2x8xi32>
    %17 = arith.cmpi slt, %14, %16 : vector<2x8xi32>
    %cst_11 = arith.constant 0.000000e+00 : f32
    %cst_12 = arith.constant -1.000000e+09 : f32
    %18 = vector.broadcast %cst_11 : f32 to vector<2x8xf32>
    %19 = vector.broadcast %cst_12 : f32 to vector<2x8xf32>
    %20 = arith.select %17, %18, %19 : vector<2x8xi1>, vector<2x8xf32>
    %21 = arith.addf %13, %20 : vector<2x8xf32>
    %cst_13 = arith.constant dense<0xFF800000> : vector<2xf32>
    %22 = vector.multi_reduction <maximumf>, %21, %cst_13 [1] : vector<2x8xf32> to vector<2xf32>
    %23 = vector.shape_cast %22 : vector<2xf32> to vector<2x1xf32>
    %24 = vector.broadcast %23 : vector<2x1xf32> to vector<2x8xf32>
    %25 = arith.subf %21, %24 : vector<2x8xf32>
    %26 = math.exp %25 : vector<2x8xf32>
    %cst_14 = arith.constant dense<0.000000e+00> : vector<2xf32>
    %27 = vector.multi_reduction <add>, %26, %cst_14 [1] : vector<2x8xf32> to vector<2xf32>
    %28 = vector.shape_cast %27 : vector<2xf32> to vector<2x1xf32>
    %29 = tpu.reciprocal %28 {approx = true} : vector<2x1xf32> -> vector<2x1xf32>
    %30 = vector.broadcast %29 : vector<2x1xf32> to vector<2x8xf32>
    %31 = arith.mulf %26, %30 : vector<2x8xf32>
    %c0_15 = arith.constant 0 : index
    %c0_16 = arith.constant 0 : index
    %32 = vector.load %arg7[%c0_15, %c0_16] : memref<2x8xf32, #tpu.memory_space<vmem>>, vector<2x8xf32>
    tpu.vector_store %arg7[%c0_15, %c0_16], %31 {strides = array<i32>} : memref<2x8xf32, #tpu.memory_space<vmem>>, vector<2x8xf32>,
    %33 = arith.extf %0 : vector<2x8x32xbf16> to vector<2x8x32xf32>
    %34 = vector.shape_cast %31 : vector<2x8xf32> to vector<2x8x1xf32>
    %35 = vector.broadcast %34 : vector<2x8x1xf32> to vector<2x8x32xf32>
    %36 = arith.mulf %33, %35 : vector<2x8x32xf32>
    %cst_17 = arith.constant dense<0.000000e+00> : vector<2x32xf32>
    %37 = vector.multi_reduction <add>, %36, %cst_17 [1] : vector<2x8x32xf32> to vector<2x32xf32>
    %c0_18 = arith.constant 0 : index
    %c0_19 = arith.constant 0 : index
    %38 = vector.load %arg6[%c0_18, %c0_19] : memref<2x32xf32, #tpu.memory_space<vmem>>, vector<2x32xf32>
    tpu.vector_store %arg6[%c0_18, %c0_19], %37 {strides = array<i32>} : memref<2x32xf32, #tpu.memory_space<vmem>>, vector<2x32xf32>,
    return
  }
  func.func @transform_0(%arg0: i32) -> (i32, i32) {
    %c0_i32 = arith.constant 0 : i32
    %c0_i32_0 = arith.constant 0 : i32
    return %arg0, %c0_i32 : i32, i32
  }
  func.func @transform_1(%arg0: i32) -> (i32, i32, i32) {
    %c0_i32 = arith.constant 0 : i32
    %c0_i32_0 = arith.constant 0 : i32
    %c0_i32_1 = arith.constant 0 : i32
    return %arg0, %c0_i32, %c0_i32_0 : i32, i32, i32
  }
  func.func @transform_2(%arg0: i32) -> (i32, i32) {
    %c0_i32 = arith.constant 0 : i32
    %c0_i32_0 = arith.constant 0 : i32
    %c0_i32_1 = arith.constant 0 : i32
    return %c0_i32, %c0_i32_0 : i32, i32
  }
  func.func @transform_3(%arg0: i32) -> (i32, i32) {
    %c0_i32 = arith.constant 0 : i32
    %c0_i32_0 = arith.constant 0 : i32
    %c0_i32_1 = arith.constant 0 : i32
    return %c0_i32, %c0_i32_0 : i32, i32
  }
  func.func @transform_4(%arg0: i32) -> (i32, i32) {
    %c0_i32 = arith.constant 0 : i32
    %c0_i32_0 = arith.constant 0 : i32
    %c0_i32_1 = arith.constant 0 : i32
    return %c0_i32, %c0_i32_0 : i32, i32
  }
  func.func @transform_5(%arg0: i32) -> (i32, i32) {
    %c0_i32 = arith.constant 0 : i32
    %c0_i32_0 = arith.constant 0 : i32
    return %arg0, %c0_i32 : i32, i32
  }
  func.func @transform_6(%arg0: i32) -> (i32, i32) {
    %c0_i32 = arith.constant 0 : i32
    %c0_i32_0 = arith.constant 0 : i32
    return %arg0, %c0_i32 : i32, i32
  }
}

</mosaic_0001>

<bundles_post_ra>
// kernel: tpu_custom_call.1
= control target key start
LH: loop header
LB: loop body
LE: loop exit
PB: predicated region body
PF: predicated region fallthrough
CT: control target
= control target key end

     0   :  { %12 = vsyncpa [#allocation3], 0  ;;  %v380_v1 = vmov 0.0   ;;  %vm381_vm0 = vmmov 0   ;;  %v382_v5 = vmov 0   ;;  %s483_s0 = inlined_call_operand.vmem [shape: s32[2,1], index: 0, kind: input, shape index: {}]   ;;  %s484_s1 = inlined_call_operand.vmem [shape: bf16[2,8,32], index: 1, kind: input, shape index: {}]   ;;  %s485_s2 = inlined_call_operand.vmem [shape: bf16[32,16], index: 2, kind: input, shape index: {}]   ;;  %s486_s3 = inlined_call_operand.vmem [shape: f32[1,16], index: 3, kind: input, shape index: {}]   ;;  %s487_s4 = inlined_call_operand.vmem [shape: f32[1,16], index: 4, kind: input, shape index: {}]   ;;  %s488_s5 = inlined_call_operand.hbm [shape: f32[2,32], index: 5, kind: output, shape index: {0}]   ;;  %s489_s6 = inlined_call_operand.hbm [shape: f32[2,8], index: 6, kind: output, shape index: {1}]  }
   0x1   :  { %v318_v0 = vld [vmem:[%s485_s2] sm:$0xff]   ;;  %302 = vmatprep.subr.bf16.mxu0 %v380_v1  ;;  %v319_v2 = vld [vmem:[%s485_s2 + $0x8] sm:$0xff]   ;;  %306 = vmatprep.mubr.msk.bf16.mxu0 %vm381_vm0, %v380_v1 }
   0x2   :  { %303 = vmatpush3.bf16.msra.mxu0 %v318_v0  ;;  %v430_v3 = vld [vmem:[%s484_s1] sm:$0xff]   ;;  %316 = vset.pattern.permute.xlu0 %v382_v5 }
   0x3   :  { %v120_v4 = vld [vmem:[%s483_s0] sm:$0x3]  ;;  %304 = vmatprep.subr.bf16.mxu0 %v380_v1 }
   0x4   :  { %13 = vsyncpa [#allocation5], 0  ;;  %122 = vperm.xlu0 %316, %v120_v4   ;;  %317 = vset.pattern.permute.xlu1 %v382_v5  ;;  %vm55_vm1 = vcmask 261120   ;;  %v118_v6 = vlaneseq  ;;  %v383_v11 = vmov -1e+09   ;;  %vm111_vm3 = vcmask 130048  }
   0x5   :  { %v293_v14 = vld [vmem:[%s486_s3] ss:$0 sm:$0xff]  ;;  %vm161_vm4 = vcmask 1041409   ;;  %vm164_vm5 = vcmask 58368   ;;  %v239_v0 = vunpack.c.l.bf16 %v430_v3  ;;  %v240_v4 = vunpack.c.h.bf16 %v430_v3  ;;  %s384_s3 = smov [#allocation4]  }
   0x6   :  { %305 = vmatpush3.bf16.msra.mxu0 %v319_v2  ;;  %v128_v7 = vshrl.u32 %v118_v6, 7  ;;  %v119_v8 = vand.u32 127, %v118_v6  ;;  %v298_v21 = vld [vmem:[%s487_s4] ss:$0 sm:$0xff]  ;;  %s281_s4 = sshll.u32 %s384_s3, 4  ;;  %s282_s4 = int_to_ptr.vmem [resolvable:$true] %s281_s4 }
   0x7   :  { %s332_s30 = scalar_lea.vmem %s282_s4, 32  ;;  %p337_p1 = scmp.lt.s32.totalorder %s282_s4, %s282_s4 }
   0x8   :  { %v437_v9 = vsub.s32 0, %v128_v7  ;;  %v136_v28 = vsub.s32 1, %v128_v7  ;;  %v155_v37 = vsub.s32 %v119_v8, %v128_v7  ;;  %p333_p0 = scmp.ne.s32.totalorder %s282_s4, %s332_s30  ;;  %p338_p2 = scmp.lt.s32.totalorder %s332_s30, %s332_s30 }
   0x9   :  { %307 = vmatmul.mubr.msk.bf16.vlgmr.msra.gmra.mrb[0].mxu0 %vm55_vm1, %v430_v3 }
   0xa   :  { %p339_p3 = por %p338_p2, %p337_p1 }
   0xc   :  { %p340_p4 = pnand %p339_p3, %p333_p0 }
  0x83   :  { %v123_v10 = vpop.permute.xlu0 %122 }
  0x84   :  { %vm124_vm2 = vcmp.lt.s32.totalorder %v119_v8, %v123_v10 }
  0x85   :  { %v125_v12 = vsel %vm124_vm2, 0.0, %v383_v11 }
  0x86   :  { %v130_v13 = vrot.slane %v125_v12, %v437_v9  ;;  %v137_v29 = vrot.slane %v125_v12, %v136_v28 }
  0x88   :  { %132 = vbcast.lane.b32.xlu1 %v130_v13, 256 }
  0xdc   :  { %v93_v15 = vpop.f32.mrb[0].mxu0 }
  0xdd   :  { %v94_v16 = vadd.f32 %v293_v14, %v93_v15  ;;  %v308_v17 = vpop.f32.mrb[1].mxu0 }
  0xde   :  { %v96_v18 = vpop.f32.mrb[2].mxu0 }
  0xdf   :  { %322 = vtanh.f32 %v94_v16  ;;  %v97_v19 = vadd.f32 %v293_v14, %v96_v18  ;;  %v309_v20 = vpop.f32.mrb[3].mxu0 }
  0xe1   :  { %324 = vtanh.f32 %v97_v19 }
  0xe9   :  { %v323_v22 = vpop.eup %322 }
  0xea   :  { %v109_v23 = vmul.f32 %v323_v22, %v298_v21 }
  0xeb   :  { %v325_v24 = vpop.eup %324 }
  0xec   :  { %v112_v25 = vsel %vm111_vm3, %v109_v23, 0.0  ;;  %v110_v26 = vmul.f32 %v325_v24, %v298_v21 }
  0xed   :  { %113 = vadd.xlane.f32.xlu0 %v112_v25 }
  0xee   :  { %v115_v27 = vsel %vm111_vm3, %v110_v26, 0.0 }
  0xef   :  { %116 = vadd.xlane.f32.xlu1 %v115_v27 }
  0xfa   :  { %v133_v30 = vpop.permute.xlu1 %132 }
 0x100   :  { %139 = vbcast.lane.b32.xlu1 %v137_v29, 256 }
 0x17a   :  { %v114_v31 = vpop.xlane.xlu0 %113 }
 0x17b   :  { %v143_v32 = vadd.f32 %v133_v30, %v114_v31 }
 0x17c   :  { %v117_v33 = vpop.xlane.xlu1 %116 }
 0x17d   :  { %148 = vperm.xlu1 %317, %v143_v32  }
 0x180   :  { %v140_v34 = vpop.permute.xlu1 %139 }
 0x181   :  { %v144_v35 = vadd.f32 %v140_v34, %v117_v33 }
 0x183   :  { %151 = vperm.xlu1 %317, %v144_v35  }
 0x1fc   :  { %v149_v36 = vpop.permute.xlu1 %148 }
 0x1fd   :  { %v156_v39 = vrot.slane %v149_v36, %v155_v37 }
 0x202   :  { %v152_v38 = vpop.permute.xlu1 %151 }
 0x203   :  { %v160_v40 = vrot.slane %v152_v38, %v155_v37 }
 0x205   :  { %v162_v41 = vsel %vm161_vm4, %v160_v40, %v156_v39 }
 0x206   :  { %v165_v42 = vsel %vm164_vm5, %v162_v41, -inf }
 0x207   :  { %166 = vmax.xlane.f32.xlu1 %v165_v42 }
 0x294   :  { %v167_v43 = vpop.xlane.xlu1 %166 }
 0x295   :  { %v172_v44 = vrot.slane %v167_v43, %v437_v9  ;;  %v176_v45 = vrot.slane %v167_v43, %v136_v28 }
 0x297   :  { %v179_v46 = vsub.f32 %v143_v32, %v172_v44  ;;  %v180_v47 = vsub.f32 %v144_v35, %v176_v45 }
 0x299   :  { %v181_v48 = vmul.f32 1.442695, %v179_v46  ;;  %v183_v49 = vmul.f32 1.442695, %v180_v47 }
 0x29b   :  { %326 = vpow2.f32 %v181_v48 }
 0x29c   :  { %328 = vpow2.f32 %v183_v49 }
 0x2a5   :  { %v327_v50 = vpop.eup %326 }
 0x2a6   :  { %188 = vperm.xlu0 %316, %v327_v50   ;;  %v329_v51 = vpop.eup %328 }
 0x2aa   :  { %191 = vperm.xlu0 %316, %v329_v51  }
 0x325   :  { %v189_v52 = vpop.permute.xlu0 %188 }
 0x326   :  { %v196_v54 = vrot.slane %v189_v52, %v155_v37 }
 0x329   :  { %v192_v53 = vpop.permute.xlu0 %191 }
 0x32a   :  { %v200_v55 = vrot.slane %v192_v53, %v155_v37 }
 0x32c   :  { %v201_v56 = vsel %vm161_vm4, %v200_v55, %v196_v54 }
 0x32d   :  { %v203_v57 = vsel %vm164_vm5, %v201_v56, 0.0 }
 0x32e   :  { %204 = vadd.xlane.f32.xlu0 %v203_v57 }
 0x3bb   :  { %v205_v58 = vpop.xlane.xlu0 %204 }
 0x3bc   :  { %330 = vrcp.f32 %v205_v58 }
 0x3c6   :  { %v331_v59 = vpop.eup %330 }
 0x3c7   :  { %v211_v60 = vrot.slane %v331_v59, %v437_v9  ;;  %v215_v62 = vrot.slane %v331_v59, %v136_v28 }
 0x3c9   :  { %v218_v61 = vmul.f32 %v327_v50, %v211_v60  ;;  %v219_v63 = vmul.f32 %v329_v51, %v215_v62 }
 0x3cb   :  { %223 = vperm.xlu1 %317, %v218_v61  }
 0x3cf   :  { %226 = vperm.xlu1 %317, %v219_v63  }
 0x44a   :  { %v224_v1 = vpop.permute.xlu1 %223 }
 0x44b   :  { %v243_v2 = vmul.f32 %v239_v0, %v224_v1  ;;  %v231_v8 = vrot.slane %v224_v1, %v155_v37 }
 0x44d   :  { %v245_v5 = vsel %vm55_vm1, %v243_v2, 0.0 }
 0x44e   :  { %v246_v6 = vrot.slane %v245_v5, 4  ;;  %v227_v7 = vpop.permute.xlu1 %226 }
 0x44f   :  { %v235_v10 = vrot.slane %v227_v7, %v155_v37  ;;  %v244_v9 = vmul.f32 %v240_v4, %v227_v7 }
 0x450   :  { %v247_v11 = vadd.f32 %v246_v6, %v245_v5 }
 0x451   :  { %v252_v12 = vsel %vm55_vm1, %v244_v9, 0.0  ;;  %v236_v13 = vsel %vm161_vm4, %v235_v10, %v231_v8 }
 0x452   :  { %v248_v14 = vrot.slane %v247_v11, 2  ;;  %v253_v15 = vrot.slane %v252_v12, 4  ;;  %238 = vst.msk [vmem:[#allocation4] sm:$0x3] %vm164_vm5, %v236_v13 }
 0x453   :  { %343 = shalt.err (!%p340_p4)
}
 0x454   :  { %s344_s9 = scalar_lea.hbm %s489_s6, 32 }
 0x455   :  { %p345_p5 = scmp.ne.s32.totalorder %s489_s6, %s344_s9  ;;  %p348_p6 = scmp.lt.u32.totalorder %s344_s9, %s489_s6 }
 0x457   :  { %p350_p7 = pnand %p348_p6, %p345_p5 }
 0x459   :  { %353 = shalt.err (!%p350_p7)
}
 0x45a   :  { %284 = dma.vmem_to_hbm [thread:$0]  %s282_s4, 32, %s489_s6, [#allocation5]   ;;  %v249_v3 = vadd.f32 %v248_v14, %v247_v11  ;;  %v254_v16 = vadd.f32 %v253_v15, %v252_v12  ;;  %vm263_vm6 = vcmask 254976  }
 0x45b   :  { %s385_s16 = smov [#allocation2]  }
 0x45c   :  { %v255_v17 = vrot.slane %v254_v16, 2  ;;  %v250_v19 = vrot.slane %v249_v3, 1  ;;  %s271_s17 = sshll.u32 %s385_s16, 4  ;;  %s272_s17 = int_to_ptr.vmem [resolvable:$true] %s271_s17 }
 0x45d   :  { %s354_s18 = scalar_lea.vmem %s272_s17, 32  ;;  %p359_p9 = scmp.lt.s32.totalorder %s272_s17, %s272_s17 }
 0x45e   :  { %v256_v18 = vadd.f32 %v255_v17, %v254_v16  ;;  %v251_v21 = vadd.f32 %v250_v19, %v249_v3  ;;  %p355_p8 = scmp.ne.s32.totalorder %s272_s17, %s354_s18  ;;  %p360_p10 = scmp.lt.s32.totalorder %s354_s18, %s354_s18 }
 0x460   :  { %v257_v20 = vrot.slane %v256_v18, 1  ;;  %p361_p11 = por %p360_p10, %p359_p9 }
 0x462   :  { %v258_v22 = vadd.f32 %v257_v20, %v256_v18  ;;  %p362_p12 = pnand %p361_p11, %p355_p8 }
 0x464   :  { %v261_v23 = vsel %vm161_vm4, %v258_v22, %v251_v21 }
 0x465   :  { %264 = vst.msk [vmem:[#allocation2] sm:$0x3] %vm263_vm6, %v261_v23 }
 0x466   :  { %365 = shalt.err (!%p362_p12)
}
 0x467   :  { %s366_s20 = scalar_lea.hbm %s488_s5, 32 }
 0x468   :  { %p367_p13 = scmp.ne.s32.totalorder %s488_s5, %s366_s20  ;;  %p370_p0 = scmp.lt.u32.totalorder %s366_s20, %s488_s5 }
 0x46a   :  { %p372_p1 = pnand %p370_p0, %p367_p13 }
 0x46c   :  { %375 = shalt.err (!%p372_p1)
}
 0x46d   :  { %274 = dma.vmem_to_hbm [thread:$0]  %s272_s17, 32, %s488_s5, [#allocation3]  }
 0x46e   :  { %376 = dma.done.wait [#allocation3], 32  }
 0x46f   :  { %377 = vsyncadd [#allocation3], 4294967264 }
 0x470   :  { %378 = dma.done.wait [#allocation5], 32  }
 0x471   :  { %379 = vsyncadd [#allocation5], 4294967264 }
 0x472   :  { %291 = vsyncpa [#allocation3], 1 }
 0x473   :  { %292 = vsyncpa [#allocation5], 1 }

</bundles_post_ra>
